<compile_context>
chip_gen: v7x
topology: tpu7x:2x2x1
jax: 0.10.0
libtpu: 0.0.40
codegen_flags: <defaults>
</compile_context>

<pallas_src>
import functools

import jax
import jax.numpy as jnp
import numpy as np
from jax.experimental import pallas as pl
from jax.experimental.pallas import tpu as pltpu


def _interp_matrix(out_size: int, in_size: int, scale_factor: float,
                   align_corners: bool) -> jnp.ndarray:
    """1-D linear-interpolation matrix (out_size, in_size), PyTorch semantics.

    Built with numpy at trace time (shapes/scale are static) so it folds into
    a constant.  Note: matches PyTorch for a user-supplied scale_factor; with
    recompute_scale_factor=True PyTorch derives the scale from the output size,
    which can differ for non-integer scale factors.
    """
    d = np.arange(out_size, dtype=np.float64)
    if align_corners:
        if out_size > 1:
            src = d * (in_size - 1) / (out_size - 1)
        else:
            src = np.zeros_like(d)
    else:
        # PyTorch: src = (dst + 0.5) / scale_factor - 0.5, clamped at 0
        src = (d + 0.5) / float(scale_factor) - 0.5
        src = np.maximum(src, 0.0)
    x0 = np.clip(np.floor(src).astype(np.int64), 0, in_size - 1)
    x1 = np.minimum(x0 + 1, in_size - 1)
    l1 = (src - x0).astype(np.float32)
    l0 = (1.0 - l1).astype(np.float32)
    m = np.zeros((out_size, in_size), dtype=np.float32)
    rows = np.arange(out_size)
    m[rows, x0] += l0
    m[rows, x1] += l1
    return jnp.asarray(m)


def _interp_kernel(x_ref, wwt_ref, wh_ref, o_ref):
    # x_ref:   (Bc, H, W)        chunk of Bc spatial planes, native dtype
    # wwt_ref: (W, W_out)        width interp matrix, already transposed
    # wh_ref:  (H_out, H)        height interp matrix
    # o_ref:   (Bc, H_out, W_out)
    bc, h, w = x_ref.shape
    h_out = wh_ref.shape[0]
    w_out = wwt_ref.shape[1]

    x = x_ref[...]                                   # native dtype, no up-cast

    # ---- width pass: one flat MXU matmul over every row of the block ----
    xw = jnp.dot(x.reshape(bc * h, w), wwt_ref[...],
                 preferred_element_type=jnp.float32)          # (bc*h, w_out) f32
    xw = xw.reshape(bc, h, w_out).astype(x.dtype)

    # ---- height pass: batched MXU matmul, shared (broadcast) weight ----
    wh_b = jnp.broadcast_to(wh_ref[...], (bc, h_out, h))
    out = jnp.einsum("boh,bhw->bow", wh_b, xw,
                     preferred_element_type=jnp.float32)      # (bc, h_out, w_out)

    o_ref[...] = out.astype(o_ref.dtype)


def _choose_block_channels(nc: int, plane_in_elems: int, plane_out_elems: int,
                           itemsize: int) -> int:
    """Pick how many (H, W) planes to process per grid step.

    Target ~4 MiB of (input + output) block per step; with double buffering and
    the f32 intermediates this stays well under the 32 MiB VMEM limit we
    request (safe on v5e / v6e / v7x).
    """
    plane_bytes = (plane_in_elems + plane_out_elems) * itemsize
    target_bytes = 4 * 1024 * 1024
    bc = max(1, min(nc, target_bytes // max(plane_bytes, 1)))
    # Ensure at least 2 grid steps when possible so both TensorCores of a v7x
    # chip get work on the "parallel" grid axis (no-op cost on v5e/v6e).
    if nc >= 2 and bc >= nc:
        bc = (nc + 1) // 2
    return int(bc)


@functools.partial(jax.jit, static_argnames=("scale_factor", "mode", "align_corners"))
def interpolate(x, *, scale_factor=2, mode="bilinear", align_corners=False):
    """Pallas equivalent of Interpolate(scale_factor, mode, align_corners)(x).

    x: (N, C, H, W) float array (NCHW, as in PyTorch).
    """
    if mode != "bilinear":
        # TODO(synk): only 'bilinear' mode is implemented (the mode used in gdemode).
        raise NotImplementedError(f"mode={mode!r} not implemented")

    N, C, H, W = x.shape
    H_out = int(H * scale_factor)
    W_out = int(W * scale_factor)

    # Interp matrices; width matrix is pre-transposed so the kernel never
    # transposes.  Cast to x.dtype so the big activation tile is never up-cast
    # (MXU accumulates in f32 regardless).
    wh = _interp_matrix(H_out, H, scale_factor, align_corners).astype(x.dtype)       # (H_out, H)
    wwt = _interp_matrix(W_out, W, scale_factor, align_corners).T.astype(x.dtype)    # (W, W_out)

    NC = N * C
    xf = x.reshape(NC, H, W)

    itemsize = jnp.dtype(x.dtype).itemsize
    Bc = _choose_block_channels(NC, H * W, H_out * W_out, itemsize)
    grid = (NC + Bc - 1) // Bc

    flops = 2 * NC * (H * W_out * W + H_out * W_out * H)
    bytes_accessed = (NC * (H * W + H_out * W_out) + wh.size + wwt.size) * itemsize

    out_flat = pl.pallas_call(
        _interp_kernel,
        out_shape=jax.ShapeDtypeStruct((NC, H_out, W_out), x.dtype),
        grid_spec=pltpu.PrefetchScalarGridSpec(
            num_scalar_prefetch=0,
            grid=(grid,),
            in_specs=[
                pl.BlockSpec((Bc, H, W), lambda b: (b, 0, 0)),
                pl.BlockSpec((W, W_out), lambda b: (0, 0)),      # resident weight
                pl.BlockSpec((H_out, H), lambda b: (0, 0)),      # resident weight
            ],
            out_specs=pl.BlockSpec((Bc, H_out, W_out), lambda b: (b, 0, 0)),
        ),
        compiler_params=pltpu.CompilerParams(
            dimension_semantics=("parallel",),
            vmem_limit_bytes=32 * 1024 * 1024,
        ),
        cost_estimate=pl.CostEstimate(
            flops=int(flops),
            transcendentals=0,
            bytes_accessed=int(bytes_accessed),
        ),
    )(xf, wwt, wh)

    return out_flat.reshape(N, C, H_out, W_out)


def _reference(x, *, scale_factor, align_corners):
    """Pure-JAX reference using the same separable formulation."""
    N, C, H, W = x.shape
    H_out, W_out = int(H * scale_factor), int(W * scale_factor)
    wh = _interp_matrix(H_out, H, scale_factor, align_corners)
    ww = _interp_matrix(W_out, W, scale_factor, align_corners)
    return jnp.einsum("oh,nchw,pw->ncop", wh, x.astype(jnp.float32), ww).astype(x.dtype)


if __name__ == "__main__":
    key = jax.random.PRNGKey(0)
    N, C, H, W = 2, 4, 16, 16
    x = jax.random.normal(key, (N, C, H, W), dtype=jnp.float32)

    # Module config: Interpolate(scale_factor=2, mode="bilinear", align_corners=False)
    out = interpolate(x, scale_factor=2, mode="bilinear", align_corners=False)
    out = jax.block_until_ready(out)

    assert out.shape == (N, C, 2 * H, 2 * W), out.shape

    ref = _reference(x, scale_factor=2, align_corners=False)
    err = float(jnp.max(jnp.abs(out - ref)))
    assert err < 1e-5, f"max abs err {err}"

    print("KERNEL_OK")
</pallas_src>

<mosaic_0001>
module attributes {stable_mosaic.version = 11 : i64} {
  func.func @_interp_kernel(%arg0: i32, %arg1: memref<4x16x16xf32, #tpu.memory_space<vmem>>, %arg2: memref<16x32xf32, #tpu.memory_space<vmem>>, %arg3: memref<32x16xf32, #tpu.memory_space<vmem>>, %arg4: memref<4x32x32xf32, #tpu.memory_space<vmem>>) attributes {dimension_semantics = [#tpu.dimension_semantics<parallel>], iteration_bounds = array<i64: 2>, scalar_prefetch = 0 : i64, scratch_operands = 0 : i64, tpu.core_type = #tpu.core_type<tc>, window_params = [{transform_indices = @transform_0, window_bounds = array<i64: 4, 16, 16>}, {pipeline_mode = #tpu.pipeline_mode<synchronous>, transform_indices = @transform_1, window_bounds = array<i64: 16, 32>}, {pipeline_mode = #tpu.pipeline_mode<synchronous>, transform_indices = @transform_2, window_bounds = array<i64: 32, 16>}, {transform_indices = @transform_3, window_bounds = array<i64: 4, 32, 32>}]} {
    %c0 = arith.constant 0 : index
    %c0_0 = arith.constant 0 : index
    %c0_1 = arith.constant 0 : index
    %0 = vector.load %arg1[%c0, %c0_0, %c0_1] : memref<4x16x16xf32, #tpu.memory_space<vmem>>, vector<4x16x16xf32>
    %1 = vector.shape_cast %0 : vector<4x16x16xf32> to vector<64x16xf32>
    %c0_2 = arith.constant 0 : index
    %c0_3 = arith.constant 0 : index
    %2 = vector.load %arg2[%c0_2, %c0_3] : memref<16x32xf32, #tpu.memory_space<vmem>>, vector<16x32xf32>
    %cst = arith.constant dense<0.000000e+00> : vector<64x32xf32>
    %3 = tpu.matmul %1, %2, %cst {dimension_numbers = #tpu.dot_dimension_numbers<[1], [0], [0], [1], [0, 0, 1, 1], [], []>} : vector<64x16xf32>, vector<16x32xf32>, vector<64x32xf32> -> vector<64x32xf32>
    %4 = vector.shape_cast %3 : vector<64x32xf32> to vector<4x16x32xf32>
    %c0_4 = arith.constant 0 : index
    %c0_5 = arith.constant 0 : index
    %5 = vector.load %arg3[%c0_4, %c0_5] : memref<32x16xf32, #tpu.memory_space<vmem>>, vector<32x16xf32>
    %6 = vector.shape_cast %5 : vector<32x16xf32> to vector<1x32x16xf32>
    %7 = vector.broadcast %6 : vector<1x32x16xf32> to vector<4x32x16xf32>
    "tpu.trace_start"() <{level = 10 : i32, message = "boh,bhw->bow"}> : () -> ()
    %cst_6 = arith.constant dense<0.000000e+00> : vector<4x32x32xf32>
    %8 = tpu.matmul %7, %4, %cst_6 {dimension_numbers = #tpu.dot_dimension_numbers<[2], [1], [1], [2], [0, 0, 0, 1, 1, 2], [0], [0]>} : vector<4x32x16xf32>, vector<4x16x32xf32>, vector<4x32x32xf32> -> vector<4x32x32xf32>
    "tpu.trace_stop"() : () -> ()
    %c0_7 = arith.constant 0 : index
    %c0_8 = arith.constant 0 : index
    %c0_9 = arith.constant 0 : index
    %9 = vector.load %arg4[%c0_7, %c0_8, %c0_9] : memref<4x32x32xf32, #tpu.memory_space<vmem>>, vector<4x32x32xf32>
    tpu.vector_store %arg4[%c0_7, %c0_8, %c0_9], %8 {strides = array<i32>} : memref<4x32x32xf32, #tpu.memory_space<vmem>>, vector<4x32x32xf32>,
    return
  }
  func.func @transform_0(%arg0: i32) -> (i32, i32, i32) {
    %c0_i32 = arith.constant 0 : i32
    %c0_i32_0 = arith.constant 0 : i32
    %c0_i32_1 = arith.constant 0 : i32
    return %arg0, %c0_i32, %c0_i32_0 : i32, i32, i32
  }
  func.func @transform_1(%arg0: i32) -> (i32, i32) {
    %c0_i32 = arith.constant 0 : i32
    %c0_i32_0 = arith.constant 0 : i32
    %c0_i32_1 = arith.constant 0 : i32
    return %c0_i32, %c0_i32_0 : i32, i32
  }
  func.func @transform_2(%arg0: i32) -> (i32, i32) {
    %c0_i32 = arith.constant 0 : i32
    %c0_i32_0 = arith.constant 0 : i32
    %c0_i32_1 = arith.constant 0 : i32
    return %c0_i32, %c0_i32_0 : i32, i32
  }
  func.func @transform_3(%arg0: i32) -> (i32, i32, i32) {
    %c0_i32 = arith.constant 0 : i32
    %c0_i32_0 = arith.constant 0 : i32
    %c0_i32_1 = arith.constant 0 : i32
    return %arg0, %c0_i32, %c0_i32_0 : i32, i32, i32
  }
}

</mosaic_0001>

<bundles_post_ra>
// kernel: interpolate.1
= control target key start
LH: loop header
LB: loop body
LE: loop exit
PB: predicated region body
PF: predicated region fallthrough
CT: control target
= control target key end

     0   :  { %8 = vsyncpa [#allocation3], 0  ;;  %s1559_s0 = inlined_call_operand.hbm [shape: f32[8,16,16], index: 0, kind: input, shape index: {}]   ;;  %s1560_s1 = inlined_call_operand.hbm [shape: f32[16,32], index: 1, kind: input, shape index: {}]   ;;  %s1561_s2 = inlined_call_operand.hbm [shape: f32[32,16], index: 2, kind: input, shape index: {}]   ;;  %s1562_s3 = inlined_call_operand.hbm [shape: f32[8,32,32], index: 3, kind: output, shape index: {}]  }
   0x1   :  { %10 = vsyncpa [#allocation3 + $0x1], 0 }
   0x2   :  { %11 = vsyncpa [#allocation6], 0 }
   0x3   :  { %12 = vsyncpa [#allocation4], 0 }
   0x4   :  { %14 = vsyncpa [#allocation4 + $0x1], 0  ;;  %s1256_s12 = smov 0   ;;  %s1258_s13 = smov 0  }
   0x5   :  { %s1260_s14 = smov 0   ;;  %s1262_s15 = smov 0  }
   0x6 LB: > { %s1277_s16 = sadd.s32 4294967295, %s1226_s15   ;;  %s841_s17 = sadd.s32 4294967294, %s1226_s15   ;;  %s1226_s15 = sphi %s1262_s15, %s1582_s15   ;;  %s1222_s14 = sphi %s1260_s14, %s1581_s14   ;;  %s1218_s13 = sphi %s1258_s13, %s1580_s13   ;;  %s1214_s12 = sphi %s1256_s12, %s1579_s12  }
   0x7   : > { %p40_p0 = scmp.ne.s32.totalorder %s1218_s13, %s1214_s12  ;;  %p1563_p1 = scmp.eq.s32.totalorder %s1277_s16, 0 }
   0x8   : > { %p112_p3 = scmp.eq.s32.totalorder %s841_s17, 1  ;;  %p842_p5 = scmp.ge.s32.totalorder %s1226_s15, 1 }
   0x9   : > { %p1286_p4 = por %p1563_p1, %p40_p0  ;;  %p119_p7 = scmp.lt.s32.totalorder %s1226_s15, 3 }
   0xa   : > { %p1291_p6 = por %p112_p3, %p40_p0  ;;  %s1228_s21 = smov [#allocation5]  }
   0xb   : > { %s1566_s18 = scalar_select %p1286_p4, 1, 0 }
   0xc   : > { %s1567_s19 = scalar_select %p1291_p6, 1, 0 }
   0xd   : > { %p1296_p8 = pnand %p842_p5, %p119_p7  ;;  %s131_s22 = sshll.u32 %s1228_s21, 4  ;;  %s1300_s22 = int_to_ptr.vmem [resolvable:$true] %s131_s22 }
   0xe   : > { %s1229_s24 = smov [#allocation7]   ;;  %s1070_s28 = scalar_lea.hbm %s1560_s1, 256 }
   0xf   : > { %p1011_p9 = pneg %p1296_p8  ;;  %s144_s25 = sshll.u32 %s1229_s24, 4  ;;  %s1311_s25 = int_to_ptr.vmem [resolvable:$true] %s144_s25 }
  0x10   : > { %p1071_p12 = scmp.ne.s32.totalorder %s1560_s1, %s1070_s28  ;;  %p1077_p5 = scmp.lt.u32.totalorder %s1070_s28, %s1560_s1 }
  0x11   : > { %p1307_p11 = pnand %p1011_p9, %p1563_p1 }
  0x13   : > { %p1072_p13 = pneg %p1307_p11 }
  0x15   : > { %p1073_p0 = pnand %p1072_p13, %p1071_p12 }
  0x17   : > { %p1074_p3 = pneg %p1073_p0 }
  0x19   : > { %p1079_p7 = pnand %p1077_p5, %p1074_p3 }
  0x1b   : > { %1082 = shalt.err (!%p1079_p7)
}
  0x1c   : > { %s1083_s6 = scalar_lea.vmem %s1300_s22, 256  ;;  %p1091_p2 = scmp.lt.s32.totalorder %s1300_s22, %s1300_s22 }
  0x1d   : > { %p1084_p9 = scmp.ne.s32.totalorder %s1300_s22, %s1083_s6  ;;  %p1092_p12 = scmp.lt.s32.totalorder %s1083_s6, %s1083_s6 }
  0x1f   : > { %p1086_p10 = pnand %p1084_p9, %p1072_p13  ;;  %p1093_p0 = por %p1092_p12, %p1091_p2 }
  0x21   : > { %p1087_p1 = pneg %p1086_p10 }
  0x23   : > { %p1094_p6 = pnand %p1093_p0, %p1087_p1 }
  0x25   : > { %1097 = shalt.err (!%p1094_p6)
}
  0x26   : > { %s1230_s7 = smov 128   ;;  %s1231_s8 = smov 8  }
  0x27   : > { %1014 = dma.hbm_to_vmem [thread:$0]  (!%p1307_p11), %s1560_s1, 256, %s1300_s22, [#allocation6], %s1230_s7, %s1230_s7, %s1231_s8  }
  0x28   : > { %s1098_s21 = scalar_lea.hbm %s1561_s2, 512 }
  0x29   : > { %p1099_p1 = scmp.ne.s32.totalorder %s1561_s2, %s1098_s21  ;;  %p1105_p10 = scmp.lt.u32.totalorder %s1098_s21, %s1561_s2 }
  0x2b   : > { %p1101_p2 = pnand %p1099_p1, %p1072_p13 }
  0x2d   : > { %p1102_p6 = pneg %p1101_p2 }
  0x2f   : > { %p1107_p3 = pnand %p1105_p10, %p1102_p6 }
  0x31   : > { %1110 = shalt.err (!%p1107_p3)
}
  0x32   : > { %s1111_s22 = scalar_lea.vmem %s1311_s25, 512  ;;  %p1119_p12 = scmp.lt.s32.totalorder %s1311_s25, %s1311_s25 }
  0x33   : > { %p1112_p5 = scmp.ne.s32.totalorder %s1311_s25, %s1111_s22  ;;  %p1120_p0 = scmp.lt.s32.totalorder %s1111_s22, %s1111_s22 }
  0x35   : > { %p1114_p7 = pnand %p1112_p5, %p1072_p13  ;;  %p1121_p1 = por %p1120_p0, %p1119_p12 }
  0x37   : > { %p1115_p9 = pneg %p1114_p7 }
  0x39   : > { %p1122_p2 = pnand %p1121_p1, %p1115_p9 }
  0x3b   : > { %1125 = shalt.err (!%p1122_p2)
}
  0x3c   : > { %1017 = dma.hbm_to_vmem [thread:$0]  (!%p1307_p11), %s1561_s2, 512, %s1311_s25, [#allocation6], %s1230_s7, %s1230_s7, %s1231_s8  }
  0x3d   : > { %s1372_s23 = sadd.s32 1, %s1226_s15   ;;  %s27_s4 = sadd.s32 1, %s1222_s14 }
  0x3e   : > { %s24_s5 = ssub.s32 %s1226_s15, %s1372_s23  ;;  %p34_p13 = scmp.ne.s32.totalorder %s1222_s14, %s1218_s13 }
  0x3f   : > { %p25_p6 = scmp.eq.s32.totalorder %s24_s5, 0  ;;  %p35_p10 = scmp.eq.s32.totalorder %s1226_s15, 0 }
  0x40   : > { %p1570_p3 = scmp.eq.s32.totalorder %s1277_s16, 1  ;;  %p1028_p7 = scmp.lt.s32.totalorder %s1226_s15, 2 }
  0x41   : > { %s1388_s9 = scalar_select %p25_p6, %s1222_s14, %s27_s4  }
  0x42   : > { %p1382_p5 = por %p1570_p3, %p34_p13  ;;  %p36_p9 = por %p35_p10, %p34_p13 }
  0x43   : > { %s158_s10 = sand.u32 1, %s1222_s14   ;;  %s886_s25 = sshll.u32 %s1226_s15, 10 }
  0x44   : > { %s1571_s6 = scalar_select %p1382_p5, 1, 0 }
  0x45   : > { %s846_s11 = sshll.u32 %s158_s10, 6  ;;  %s1395_s24 = scalar_lea.hbm %s1559_s0, %s886_s25 }
  0x46   : > { %s162_s26 = scalar_lea.vmem [#allocation2], %s846_s11  ;;  %p1399_p11 = pnand %p1028_p7, %p36_p9 }
  0x47   : > { %s170_s27 = sshll.u32 %s162_s26, 4  ;;  %s1403_s22 = scalar_lea.sflag [#allocation3], %s158_s10  ;;  %s1397_s27 = int_to_ptr.vmem [resolvable:$true] %s170_s27 }
  0x48   : > { %s1126_s29 = scalar_lea.hbm %s1395_s24, 1024  ;;  %p1128_p0 = pneg %p1399_p11 }
  0x49   : > { %p1127_p12 = scmp.ne.s32.totalorder %s1395_s24, %s1126_s29  ;;  %s1131_s5 = scalar_lea.hbm %s1559_s0, 2048 }
  0x4a   : > { %p1132_p13 = scmp.lt.u32.totalorder %s1395_s24, %s1559_s0  ;;  %p1133_p6 = scmp.lt.u32.totalorder %s1131_s5, %s1126_s29 }
  0x4b   : > { %p1129_p1 = pnand %p1128_p0, %p1127_p12  ;;  %p1135_p3 = scmp.lt.u32.totalorder %s1126_s29, %s1395_s24 }
  0x4c   : > { %p1134_p10 = por %p1133_p6, %p1132_p13 }
  0x4d   : > { %p1130_p2 = pneg %p1129_p1 }
  0x4e   : > { %p1136_p7 = por %p1135_p3, %p1134_p10 }
  0x50   : > { %p1137_p9 = pnand %p1136_p7, %p1130_p2 }
  0x52   : > { %1140 = shalt.err (!%p1137_p9)
}
  0x53   : > { %s1141_s10 = scalar_lea.vmem %s1397_s27, 1024  ;;  %s1232_s17 = smov [#allocation2]  }
  0x54   : > { %p1142_p12 = scmp.ne.s32.totalorder %s1397_s27, %s1141_s10  ;;  %s1146_s21 = sshll.u32 %s1232_s17, 4  ;;  %s1147_s21 = int_to_ptr.vmem [resolvable:$false] %s1146_s21 }
  0x55   : > { %s1148_s26 = scalar_lea.vmem %s1147_s21, 2048  ;;  %p1149_p4 = scmp.lt.s32.totalorder %s1397_s27, %s1147_s21 }
  0x56   : > { %p1144_p1 = pnand %p1142_p12, %p1128_p0  ;;  %p1150_p13 = scmp.lt.s32.totalorder %s1148_s26, %s1141_s10 }
  0x58   : > { %p1145_p5 = pneg %p1144_p1  ;;  %p1151_p6 = por %p1150_p13, %p1149_p4 }
  0x5a   : > { %p1152_p10 = pnand %p1151_p6, %p1145_p5 }
  0x5c   : > { %1155 = shalt.err (!%p1152_p10)
}
  0x5d   : > { %1021 = dma.hbm_to_vmem [thread:$0]  (!%p1399_p11), %s1395_s24, 1024, %s1397_s27, %s1403_s22, %s1230_s7, %s1230_s7, %s1231_s8  }
  0x5e   : > { %182 = sbr.rel (%p1296_p8) target bundleno = 579 (0x243), region = 32  ;;  %s1437_s29 = sand.u32 (!%p1296_p8), 1, %s1218_s13  }
  0x5f   : > { %s851_s30 = sshll.u32 (!%p1296_p8), %s1437_s29, 6  ;;  %s185_s4 = scalar_lea.sflag (!%p1296_p8), [#allocation3], %s1437_s29 }
  0x60   : > { %s188_s5 = scalar_lea.vmem (!%p1296_p8), [#allocation2], %s851_s30  ;;  %p1573_p4 = scmp.ne.s32.totalorder (!%p1296_p8), %s1566_s18, 0 }
  0x65   : > { %1201 = dma.done.wait (%p1573_p4), %s185_s4, 1024  }
  0x66   : > { %1203 = vsyncadd (%p1573_p4), %s185_s4, 4294966272  ;;  %p1574_p5 = scmp.eq.s32.totalorder %s1277_s16, 0 }
  0x68   : > { %1205 = dma.done.wait (%p1574_p5), [#allocation6], 768   ;;  %p1575_p11 = pmov %p1574_p5 }
  0x69   : > { %vm231_vm0 = vcmask 130048   ;;  %v229_v0 = vld [vmem:[#allocation5] sm:$0xff]  ;;  %v230_v1 = vld [vmem:[#allocation5 + $0x8] sm:$0xff]  ;;  %v223_v5 = vld [vmem:[%s188_s5 + $0x10] sm:$0xff]  ;;  %s854_s18 = sshll.u32 %s1437_s29, 7  ;;  %vm717_vm1 = vcmask 261120  }
  0x6a   : > { %1207 = vsyncadd (%p1575_p11), [#allocation6], 4294966528  ;;  %v221_v2 = vld [vmem:[%s188_s5] sm:$0xff]  ;;  %v979_v3 = vpack.c.bf16 %v230_v1, %v229_v0  ;;  %v222_v4 = vld [vmem:[%s188_s5 + $0x8] sm:$0xff]  ;;  %s1474_s20 = scalar_lea.vmem [#allocation8], %s854_s18  ;;  %s888_s7 = sshll.u32 %s1277_s16, 11 }
  0x6b   : > { %927 = vmatprep.mubr.msk.f32.mxu0 %vm231_vm0, %v221_v2  ;;  %v224_v6 = vld [vmem:[%s188_s5 + $0x18] sm:$0xff]  ;;  %v225_v7 = vld [vmem:[%s188_s5 + $0x20] sm:$0xff]  ;;  %v226_v8 = vld [vmem:[%s188_s5 + $0x28] sm:$0xff]  ;;  %s749_s8 = sshll.u32 %s1474_s20, 4  ;;  %s1509_s28 = scalar_lea.hbm %s1562_s3, %s888_s7  ;;  %s1511_s8 = int_to_ptr.vmem [resolvable:$true] %s749_s8 }
  0x6c   : > { %980 = vmatprep.subr.bf16.mxu0 %v979_v3  ;;  %v227_v9 = vld [vmem:[%s188_s5 + $0x30] sm:$0xff]  ;;  %v228_v10 = vld [vmem:[%s188_s5 + $0x38] sm:$0xff]  ;;  %v363_v19 = vld [vmem:[#allocation7 + $0x10] sm:$0xff]  ;;  %s735_s16 = scalar_lea.sflag [#allocation4], %s1437_s29  ;;  %s1156_s22 = scalar_lea.vmem %s1511_s8, 2048 }
  0x6d   : > { %982 = vmatpush3.bf16.msra.mxu0 %v979_v3  ;;  %v361_v11 = vld [vmem:[#allocation7] sm:$0xff]  ;;  %v362_v17 = vld [vmem:[#allocation7 + $0x8] sm:$0xff]  ;;  %v364_v22 = vld [vmem:[#allocation7 + $0x18] sm:$0xff]  ;;  %p1157_p8 = scmp.ne.s32.totalorder %s1511_s8, %s1156_s22  ;;  %p1576_p0 = scmp.ne.s32.totalorder %s1571_s6, 0 }
  0x6e   : > { %943 = vmatprep.mubr.msk.f32.mxu1 %vm231_vm0, %v361_v11  ;;  %s1233_s11 = smov [#allocation8]  }
  0x6f   : > { %p1158_p2 = pnand %p1157_p8, %p1576_p0  ;;  %s1160_s25 = sshll.u32 %s1233_s11, 4  ;;  %s1161_s25 = int_to_ptr.vmem [resolvable:$false] %s1160_s25 }
  0x70   : > { %928 = vmatmul.mubr.msk.f32.vlgmr.msra.gmra.mrb[0].mxu0 %vm231_vm0, %v222_v4  ;;  %s1162_s10 = scalar_lea.vmem %s1161_s25, 4096  ;;  %p1163_p7 = scmp.lt.s32.totalorder %s1511_s8, %s1161_s25 }
  0x71   : > { %930 = vmatprep.mubr.msk.f32.mxu0 %vm231_vm0, %v223_v5  ;;  %p1159_p3 = pneg %p1158_p2  ;;  %p1164_p9 = scmp.lt.s32.totalorder %s1162_s10, %s1156_s22 }
  0x73   : > { %p1165_p12 = por %p1164_p9, %p1163_p7 }
  0x74   : > { %931 = vmatmul.mubr.msk.f32.gmra.mrb[2].mxu0 %vm231_vm0, %v224_v6 }
  0x75   : > { %933 = vmatprep.mubr.msk.f32.mxu0 %vm231_vm0, %v225_v7  ;;  %p1166_p1 = pnand %p1165_p12, %p1159_p3 }
  0x78   : > { %934 = vmatmul.mubr.msk.f32.gmra.mrb[4].mxu0 %vm231_vm0, %v226_v8 }
  0x79   : > { %936 = vmatprep.mubr.msk.f32.mxu0 %vm231_vm0, %v227_v9 }
  0x7c   : > { %937 = vmatmul.mubr.msk.f32.gmra.mrb[6].mxu0 %vm231_vm0, %v228_v10 }
  0x7d   : > { %963 = vmatprep.mubr.msk.f32.mxu0 %vm231_vm0, %v361_v11 }
 0x143   : > { %v929_v12 = vpop.f32.mrb[0].mxu0 }
 0x144   : > { %v322_v13 = vpop.f32.mrb[1].mxu0 }
 0x145   : > { %v983_v14 = vpack.c.bf16 %v929_v12, %v322_v13 }
 0x147   : > { %v932_v15 = vpop.f32.mrb[2].mxu0  ;;  %984 = vmatprep.subr.bf16.mxu1 %v983_v14 }
 0x148   : > { %v332_v16 = vpop.f32.mrb[3].mxu0  ;;  %986 = vmatpush3.bf16.msra.mxu1 %v983_v14 }
 0x149   : > { %v987_v18 = vpack.c.bf16 %v932_v15, %v332_v16 }
 0x14b   : > { %v935_v20 = vpop.f32.mrb[4].mxu0  ;;  %988 = vmatprep.subr.bf16.mxu1 %v987_v18  ;;  %944 = vmatmul.mubr.msk.f32.vlgmr.msra.gmra.mrb[0].mxu1 %vm231_vm0, %v362_v17 }
 0x14c   : > { %v342_v21 = vpop.f32.mrb[5].mxu0  ;;  %990 = vmatpush3.bf16.msra.mxu1 %v987_v18  ;;  %946 = vmatprep.mubr.msk.f32.mxu1 %vm231_vm0, %v363_v19 }
 0x14d   : > { %v991_v23 = vpack.c.bf16 %v935_v20, %v342_v21 }
 0x14f   : > { %992 = vmatprep.subr.bf16.mxu0 %v991_v23  ;;  %v938_v24 = vpop.f32.mrb[6].mxu0  ;;  %947 = vmatmul.mubr.msk.f32.gmra.mrb[2].mxu1 %vm231_vm0, %v364_v22 }
 0x150   : > { %994 = vmatpush3.bf16.msra.mxu0 %v991_v23  ;;  %v352_v25 = vpop.f32.mrb[7].mxu0  ;;  %953 = vmatprep.mubr.msk.f32.mxu1 %vm231_vm0, %v361_v11 }
 0x151   : > { %v995_v26 = vpack.c.bf16 %v938_v24, %v352_v25 }
 0x153   : > { %996 = vmatprep.subr.bf16.mxu1 %v995_v26  ;;  %954 = vmatmul.mubr.msk.f32.vlgmr.msra.gmra.mrb[4].mxu1 %vm231_vm0, %v362_v17 }
 0x154   : > { %998 = vmatpush3.bf16.msra.mxu1 %v995_v26  ;;  %956 = vmatprep.mubr.msk.f32.mxu1 %vm231_vm0, %v363_v19 }
 0x155   : > { %964 = vmatmul.mubr.msk.f32.vlgmr.msra.gmra.mrb[8].mxu0 %vm231_vm0, %v362_v17 }
 0x156   : > { %966 = vmatprep.mubr.msk.f32.mxu0 %vm231_vm0, %v363_v19 }
 0x157   : > { %957 = vmatmul.mubr.msk.f32.gmra.mrb[6].mxu1 %vm231_vm0, %v364_v22 }
 0x158   : > { %973 = vmatprep.mubr.msk.f32.mxu1 %vm231_vm0, %v361_v11 }
 0x159   : > { %967 = vmatmul.mubr.msk.f32.gmra.mrb[10].mxu0 %vm231_vm0, %v364_v22 }
 0x15b   : > { %974 = vmatmul.mubr.msk.f32.vlgmr.msra.gmra.mrb[8].mxu1 %vm231_vm0, %v362_v17 }
 0x15c   : > { %976 = vmatprep.mubr.msk.f32.mxu1 %vm231_vm0, %v363_v19 }
 0x15f   : > { %977 = vmatmul.mubr.msk.f32.gmra.mrb[10].mxu1 %vm231_vm0, %v364_v22 }
 0x21e   : > { %v945_v27 = vpop.f32.mrb[0].mxu1 }
 0x21f   : > { %719 = vst.msk [vmem:[%s1474_s20 + $0x8] sm:$0xff] %vm717_vm1, %v945_v27  ;;  %v443_v28 = vpop.f32.mrb[1].mxu1 }
 0x220   : > { %718 = vst.msk [vmem:[%s1474_s20] sm:$0xff] %vm717_vm1, %v443_v28 }
 0x222   : > { %v948_v29 = vpop.f32.mrb[2].mxu1 }
 0x223   : > { %721 = vst.msk [vmem:[%s1474_s20 + $0x18] sm:$0xff] %vm717_vm1, %v948_v29  ;;  %v453_v30 = vpop.f32.mrb[3].mxu1 }
 0x224   : > { %720 = vst.msk [vmem:[%s1474_s20 + $0x10] sm:$0xff] %vm717_vm1, %v453_v30 }
 0x226   : > { %v955_v31 = vpop.f32.mrb[4].mxu1 }
 0x227   : > { %723 = vst.msk [vmem:[%s1474_s20 + $0x28] sm:$0xff] %vm717_vm1, %v955_v31  ;;  %v528_v32 = vpop.f32.mrb[5].mxu1 }
 0x228   : > { %722 = vst.msk [vmem:[%s1474_s20 + $0x20] sm:$0xff] %vm717_vm1, %v528_v32  ;;  %v965_v33 = vpop.f32.mrb[8].mxu0 }
 0x229   : > { %727 = vst.msk [vmem:[%s1474_s20 + $0x48] sm:$0xff] %vm717_vm1, %v965_v33  ;;  %v613_v34 = vpop.f32.mrb[9].mxu0 }
 0x22a   : > { %v958_v35 = vpop.f32.mrb[6].mxu1  ;;  %726 = vst.msk [vmem:[%s1474_s20 + $0x40] sm:$0xff] %vm717_vm1, %v613_v34 }
 0x22b   : > { %725 = vst.msk [vmem:[%s1474_s20 + $0x38] sm:$0xff] %vm717_vm1, %v958_v35  ;;  %v538_v36 = vpop.f32.mrb[7].mxu1 }
 0x22c   : > { %724 = vst.msk [vmem:[%s1474_s20 + $0x30] sm:$0xff] %vm717_vm1, %v538_v36  ;;  %v968_v37 = vpop.f32.mrb[10].mxu0 }
 0x22d   : > { %729 = vst.msk [vmem:[%s1474_s20 + $0x58] sm:$0xff] %vm717_vm1, %v968_v37  ;;  %v623_v38 = vpop.f32.mrb[11].mxu0 }
 0x22e   : > { %v975_v39 = vpop.f32.mrb[8].mxu1  ;;  %728 = vst.msk [vmem:[%s1474_s20 + $0x50] sm:$0xff] %vm717_vm1, %v623_v38 }
 0x22f   : > { %731 = vst.msk [vmem:[%s1474_s20 + $0x68] sm:$0xff] %vm717_vm1, %v975_v39  ;;  %v698_v40 = vpop.f32.mrb[9].mxu1 }
 0x230   : > { %730 = vst.msk [vmem:[%s1474_s20 + $0x60] sm:$0xff] %vm717_vm1, %v698_v40 }
 0x232   : > { %v978_v41 = vpop.f32.mrb[10].mxu1 }
 0x233   : > { %733 = vst.msk [vmem:[%s1474_s20 + $0x78] sm:$0xff] %vm717_vm1, %v978_v41  ;;  %v708_v42 = vpop.f32.mrb[11].mxu1 }
 0x234   : > { %732 = vst.msk [vmem:[%s1474_s20 + $0x70] sm:$0xff] %vm717_vm1, %v708_v42 }
 0x235   : > { %1169 = shalt.err (!%p1166_p1)
}
 0x236   : > { %s1170_s17 = scalar_lea.hbm %s1509_s28, 2048  ;;  %s1174_s30 = scalar_lea.hbm %s1562_s3, 4096 }
 0x237   : > { %p1171_p13 = scmp.ne.s32.totalorder %s1509_s28, %s1170_s17  ;;  %p1175_p4 = scmp.lt.u32.totalorder %s1509_s28, %s1562_s3 }
 0x238   : > { %p1176_p5 = scmp.lt.u32.totalorder %s1174_s30, %s1170_s17  ;;  %p1178_p8 = scmp.lt.u32.totalorder %s1170_s17, %s1509_s28 }
 0x239   : > { %p1172_p6 = pnand %p1171_p13, %p1576_p0 }
 0x23a   : > { %p1177_p11 = por %p1176_p5, %p1175_p4 }
 0x23b   : > { %p1173_p10 = pneg %p1172_p6 }
 0x23c   : > { %p1179_p2 = por %p1178_p8, %p1177_p11 }
 0x23e   : > { %p1180_p3 = pnand %p1179_p2, %p1173_p10 }
 0x240   : > { %1183 = shalt.err (!%p1180_p3)
}
 0x241   : > { %s1234_s18 = smov 128   ;;  %s1235_s20 = smov 8  }
 0x242   : > { %1009 = dma.vmem_to_hbm [thread:$0]  (%p1576_p0), %s1511_s8, 2048, %s1509_s28, %s735_s16, %s1234_s18, %s1234_s18, %s1235_s20  }
 0x243 PF: > { %s764_s7 = sand.u32 1, %s1214_s12   ;;  %p1577_p7 = scmp.ne.s32.totalorder %s1567_s19, 0 }
 0x244   : > { %p1578_p9 = scmp.ge.s32.totalorder %s1226_s15, 2  ;;  %s765_s24 = scalar_lea.sflag [#allocation4], %s764_s7 }
 0x246   : > { %p1023_p12 = pnand %p1578_p9, %p1577_p7 }
 0x248   : > { %1209 = dma.done.wait (!%p1023_p12), %s765_s24, 2048  }
 0x249   : > { %1211 = vsyncadd (!%p1023_p12), %s765_s24, 4294965248  ;;  %p17_p1 = scmp.ge.s32.totalorder %s1372_s23, 4   ;;  %s1579_s12 = smov %s1218_s13 }
 0x24a   : > { %s1580_s13 = smov %s1222_s14  ;;  %s1581_s14 = smov %s1388_s9 }
 0x24b   : > { %s1582_s15 = smov %s1372_s23  ;;  %19 = sbr.rel (!%p17_p1) target bundleno = 6 (0x6), region = 85 }
 0x252   :  { %770 = vsyncpa [#allocation3], 1 }
 0x253   :  { %772 = vsyncpa [#allocation3 + $0x1], 1 }
 0x254   :  { %773 = vsyncpa [#allocation6], 1 }
 0x255   :  { %774 = vsyncpa [#allocation4], 1 }
 0x256   :  { %776 = vsyncpa [#allocation4 + $0x1], 1 }

</bundles_post_ra>
